<compile_context>
chip_gen: v5e
topology: v5e:2x2
jax: 0.10.0
libtpu: 0.0.40
codegen_flags: <defaults>
</compile_context>

<pallas_src>
import functools

import jax
import jax.numpy as jnp
from jax.experimental import pallas as pl
from jax.experimental.pallas import tpu as pltpu


def _embeddings_kernel(wid_ref, pid_ref,            # scalar prefetch (SMEM), (N,) int32 each
                       wtab_hbm, ptab_hbm,          # embedding tables, left in HBM
                       const_ref,                   # (8, H) f32: [type0, gamma, beta, pad...]
                       out_ref,                     # (tile_rows, H)
                       wbuf, pbuf, sems,            # scratch: staging buffers + DMA sems
                       *, eps, chunk, n_chunks):
    t = pl.program_id(0)
    H = out_ref.shape[1]
    tile_base = t * (chunk * n_chunks)

    def issue_chunk(c):
        base = tile_base + c * chunk

        @pl.loop(0, chunk)
        def _(r):
            wid = wid_ref[base + r]
            pid = pid_ref[base + r]
            pltpu.make_async_copy(wtab_hbm.at[pl.ds(wid, 1)],
                                  wbuf.at[c, pl.ds(r, 1)],
                                  sems.at[0, c]).start()
            pltpu.make_async_copy(ptab_hbm.at[pl.ds(pid, 1)],
                                  pbuf.at[c, pl.ds(r, 1)],
                                  sems.at[1, c]).start()

    def wait_chunk(c):
        @pl.loop(0, chunk)
        def _(r):
            # Dummy static src slice: only the transfer shape matters for the wait.
            pltpu.make_async_copy(wtab_hbm.at[pl.ds(0, 1)],
                                  wbuf.at[c, pl.ds(r, 1)],
                                  sems.at[0, c]).wait()
            pltpu.make_async_copy(ptab_hbm.at[pl.ds(0, 1)],
                                  pbuf.at[c, pl.ds(r, 1)],
                                  sems.at[1, c]).wait()

    type0 = const_ref[0:1, :]
    gamma = const_ref[1:2, :]
    beta = const_ref[2:3, :]

    # Kick off every gather DMA for this tile up front ...
    for c in range(n_chunks):
        issue_chunk(c)

    # ... then consume chunk by chunk: chunk c+1's DMAs overlap chunk c's LayerNorm.
    inv_h = 1.0 / float(H)
    for c in range(n_chunks):
        wait_chunk(c)
        x = wbuf[c].astype(jnp.float32) + pbuf[c].astype(jnp.float32) + type0  # (chunk, H)
        # Fused LayerNorm statistics (biased variance, like torch.nn.LayerNorm).
        s1 = jnp.sum(x, axis=-1, keepdims=True)
        s2 = jnp.sum(x * x, axis=-1, keepdims=True)
        mean = s1 * inv_h
        var = jnp.maximum(s2 * inv_h - mean * mean, 0.0)
        y = (x - mean) * jax.lax.rsqrt(var + eps)
        y = y * gamma + beta
        out_ref[pl.ds(c * chunk, chunk), :] = y.astype(out_ref.dtype)


def roberta_embeddings(input_ids, params, *, pad_token_id, layer_norm_eps=1e-12,
                       tile_rows=256, out_dtype=jnp.float32):
    """input_ids: [B, S] int.  Returns [B, S, H] in `out_dtype`."""
    B, S = input_ids.shape
    W_word = params["word"]
    W_pos = params["pos"]
    W_type = params["type"]
    gamma = params["gamma"]
    beta = params["beta"]
    V, H = W_word.shape
    N = B * S

    input_ids = input_ids.astype(jnp.int32)

    # create_position_ids_from_input_ids (padding tokens keep padding_idx).
    mask = (input_ids != pad_token_id).astype(jnp.int32)
    position_ids = jnp.cumsum(mask, axis=1) * mask + pad_token_id

    wids = input_ids.reshape(N)
    pids = position_ids.reshape(N).astype(jnp.int32)

    # token_type_ids defaults to all-zeros on this forward path -> W_type[0] broadcast.
    # TODO(synk): non-zero token_type_ids / inputs_embeds code paths are not implemented.
    const = jnp.zeros((8, H), jnp.float32)
    const = const.at[0].set(W_type[0].astype(jnp.float32))
    const = const.at[1].set(gamma.astype(jnp.float32))
    const = const.at[2].set(beta.astype(jnp.float32))

    # Row tiling over B*S (gives the pipeline / megacore enough grid points).
    tS = tile_rows if (tile_rows <= N and N % tile_rows == 0) else N
    n_chunks = 2 if (tS % 16 == 0) else 1          # double-buffered staging when possible
    chunk = tS // n_chunks
    num_tiles = N // tS

    tab_bytes = jnp.dtype(W_word.dtype).itemsize
    out_bytes = jnp.dtype(out_dtype).itemsize
    vmem_limit = (2 * n_chunks * chunk * H * tab_bytes   # word + pos staging buffers
                  + 2 * tS * H * out_bytes               # double-buffered output tile
                  + 2 * 8 * H * 4                        # constant block
                  + (8 << 20))                           # headroom / internal scratch

    kernel = functools.partial(_embeddings_kernel, eps=layer_norm_eps,
                               chunk=chunk, n_chunks=n_chunks)

    out = pl.pallas_call(
        kernel,
        out_shape=jax.ShapeDtypeStruct((N, H), out_dtype),
        grid_spec=pltpu.PrefetchScalarGridSpec(
            num_scalar_prefetch=2,
            grid=(num_tiles,),
            in_specs=[
                pl.BlockSpec(memory_space=pl.ANY),                 # word table (HBM)
                pl.BlockSpec(memory_space=pl.ANY),                 # position table (HBM)
                pl.BlockSpec((8, H), lambda t, wid, pid: (0, 0)),  # [type0, gamma, beta]
            ],
            out_specs=pl.BlockSpec((tS, H), lambda t, wid, pid: (t, 0)),
            scratch_shapes=[
                pltpu.VMEM((n_chunks, chunk, H), W_word.dtype),    # word row staging
                pltpu.VMEM((n_chunks, chunk, H), W_pos.dtype),     # position row staging
                pltpu.SemaphoreType.DMA((2, n_chunks)),
            ]),
        compiler_params=pltpu.CompilerParams(
            dimension_semantics=("parallel",),
            vmem_limit_bytes=int(vmem_limit)),
    )(wids, pids, W_word, W_pos, const)

    return out.reshape(B, S, H)


def _reference(input_ids, params, *, pad_token_id, layer_norm_eps=1e-12):
    W_word, W_pos, W_type, gamma, beta = (
        params["word"], params["pos"], params["type"], params["gamma"], params["beta"])
    mask = (input_ids != pad_token_id).astype(jnp.int32)
    position_ids = jnp.cumsum(mask, axis=1) * mask + pad_token_id
    token_type_ids = jnp.zeros_like(input_ids)
    x = W_word[input_ids] + W_type[token_type_ids] + W_pos[position_ids]
    mean = jnp.mean(x, axis=-1, keepdims=True)
    var = jnp.mean((x - mean) ** 2, axis=-1, keepdims=True)
    y = (x - mean) / jnp.sqrt(var + layer_norm_eps)
    return y * gamma + beta


if __name__ == "__main__":
    # Small, module-consistent config.
    vocab_size = 64
    max_position_embeddings = 64
    type_vocab_size = 2
    hidden_size = 128
    pad_token_id = 1
    layer_norm_eps = 1e-12
    B, S = 2, 16

    key = jax.random.PRNGKey(0)
    k_w, k_p, k_t, k_g, k_b, k_ids = jax.random.split(key, 6)

    W_word = 0.02 * jax.random.normal(k_w, (vocab_size, hidden_size), jnp.float32)
    W_pos = 0.02 * jax.random.normal(k_p, (max_position_embeddings, hidden_size), jnp.float32)
    W_type = 0.02 * jax.random.normal(k_t, (type_vocab_size, hidden_size), jnp.float32)
    # nn.Embedding(padding_idx=...) zeroes the padding row at init.
    W_word = W_word.at[pad_token_id].set(0.0)
    W_pos = W_pos.at[pad_token_id].set(0.0)
    gamma = 1.0 + 0.1 * jax.random.normal(k_g, (hidden_size,), jnp.float32)
    beta = 0.1 * jax.random.normal(k_b, (hidden_size,), jnp.float32)
    params = {"word": W_word, "pos": W_pos, "type": W_type, "gamma": gamma, "beta": beta}

    # Deterministic input ids with trailing padding in row 1.
    input_ids = jax.random.randint(k_ids, (B, S), 2, vocab_size, dtype=jnp.int32)
    input_ids = input_ids.at[1, S - 5:].set(pad_token_id)

    out = roberta_embeddings(input_ids, params,
                             pad_token_id=pad_token_id,
                             layer_norm_eps=layer_norm_eps,
                             tile_rows=16)          # 2 row-tiles of 16, chunks of 8
    out = jax.block_until_ready(out)

    ref = _reference(input_ids, params,
                     pad_token_id=pad_token_id,
                     layer_norm_eps=layer_norm_eps)
    assert out.shape == (B, S, hidden_size)
    assert jnp.allclose(out, ref, atol=1e-4, rtol=1e-4), "mismatch vs reference"

    print("KERNEL_OK")
</pallas_src>

<mosaic_0001>
module attributes {stable_mosaic.version = 11 : i64} {
  func.func @_embeddings_kernel(%arg0: i32, %arg1: memref<32xi32, #tpu.memory_space<smem>>, %arg2: memref<32xi32, #tpu.memory_space<smem>>, %arg3: memref<64x128xf32, #tpu.memory_space<any>>, %arg4: memref<64x128xf32, #tpu.memory_space<any>>, %arg5: memref<8x128xf32, #tpu.memory_space<vmem>>, %arg6: memref<16x128xf32, #tpu.memory_space<vmem>>, %arg7: memref<2x8x128xf32, #tpu.memory_space<vmem>>, %arg8: memref<2x8x128xf32, #tpu.memory_space<vmem>>, %arg9: memref<2x2x!tpu.dma_semaphore, #tpu.memory_space<semaphore_mem>>) attributes {dimension_semantics = [#tpu.dimension_semantics<parallel>], iteration_bounds = array<i64: 2>, scalar_prefetch = 2 : i64, scratch_operands = 3 : i64, tpu.core_type = #tpu.core_type<tc>, window_params = [{}, {}, {pipeline_mode = #tpu.pipeline_mode<synchronous>, transform_indices = @transform_2, window_bounds = array<i64: 8, 128>}, {transform_indices = @transform_3, window_bounds = array<i64: 16, 128>}]} {
    %c16_i32 = arith.constant 16 : i32
    %0 = arith.muli %arg0, %c16_i32 : i32
    %c0 = arith.constant 0 : index
    %c0_0 = arith.constant 0 : index
    %1 = vector.load %arg5[%c0, %c0_0] : memref<8x128xf32, #tpu.memory_space<vmem>>, vector<1x128xf32>
    %c1 = arith.constant 1 : index
    %c0_1 = arith.constant 0 : index
    %2 = vector.load %arg5[%c1, %c0_1] : memref<8x128xf32, #tpu.memory_space<vmem>>, vector<1x128xf32>
    %c2 = arith.constant 2 : index
    %c0_2 = arith.constant 0 : index
    %3 = vector.load %arg5[%c2, %c0_2] : memref<8x128xf32, #tpu.memory_space<vmem>>, vector<1x128xf32>
    %c0_i32 = arith.constant 0 : i32
    %4 = arith.addi %0, %c0_i32 : i32
    %c0_i32_3 = arith.constant 0 : i32
    %c8_i32 = arith.constant 8 : i32
    %5 = arith.addi %c0_i32_3, %c8_i32 : i32
    %c1_i32 = arith.constant 1 : i32
    scf.for %arg10 = %c0_i32_3 to %5 step %c1_i32  : i32 {
      %c1_i32_44 = arith.constant 1 : i32
      %74 = arith.muli %arg10, %c1_i32_44 : i32
      %c0_i32_45 = arith.constant 0 : i32
      %75 = arith.addi %c0_i32_45, %74 : i32
      %76 = arith.addi %4, %75 : i32
      %77 = arith.index_cast %76 : i32 to index
      %78 = memref.load %arg1[%77] : memref<32xi32, #tpu.memory_space<smem>>
      %79 = arith.addi %4, %75 : i32
      %80 = arith.index_cast %79 : i32 to index
      %81 = memref.load %arg2[%80] : memref<32xi32, #tpu.memory_space<smem>>
      %c0_i32_46 = arith.constant 0 : i32
      %c0_i32_47 = arith.constant 0 : i32
      %c0_i32_48 = arith.constant 0 : i32
      %c0_i32_49 = arith.constant 0 : i32
      %82 = tpu.memref_slice %arg3[%78, %c0_i32_49] : memref<64x128xf32, #tpu.memory_space<any>> -> memref<1x128xf32, #tpu.memory_space<any>>
      %c0_i32_50 = arith.constant 0 : i32
      %83 = tpu.memref_slice %arg7[%c0_i32_46, %75, %c0_i32_50] : memref<2x8x128xf32, #tpu.memory_space<vmem>> -> memref<1x1x128xf32, #tpu.memory_space<vmem>>
      %84 = tpu.memref_squeeze %83 : memref<1x1x128xf32, #tpu.memory_space<vmem>> -> memref<1x128xf32, #tpu.memory_space<vmem>>
      %85 = tpu.memref_slice %arg9[%c0_i32_47, %c0_i32_48] : memref<2x2x!tpu.dma_semaphore, #tpu.memory_space<semaphore_mem>> -> memref<1x1x!tpu.dma_semaphore, #tpu.memory_space<semaphore_mem>>
      %86 = tpu.memref_squeeze %85 : memref<1x1x!tpu.dma_semaphore, #tpu.memory_space<semaphore_mem>> -> memref<!tpu.dma_semaphore, #tpu.memory_space<semaphore_mem>>
      tpu.enqueue_dma source(%82 : memref<1x128xf32, #tpu.memory_space<any>>) target(%84 : memref<1x128xf32, #tpu.memory_space<vmem>>) target_semaphore(%86 : memref<!tpu.dma_semaphore, #tpu.memory_space<semaphore_mem>>)
      %c0_i32_51 = arith.constant 0 : i32
      %c1_i32_52 = arith.constant 1 : i32
      %c0_i32_53 = arith.constant 0 : i32
      %c0_i32_54 = arith.constant 0 : i32
      %87 = tpu.memref_slice %arg4[%81, %c0_i32_54] : memref<64x128xf32, #tpu.memory_space<any>> -> memref<1x128xf32, #tpu.memory_space<any>>
      %c0_i32_55 = arith.constant 0 : i32
      %88 = tpu.memref_slice %arg8[%c0_i32_51, %75, %c0_i32_55] : memref<2x8x128xf32, #tpu.memory_space<vmem>> -> memref<1x1x128xf32, #tpu.memory_space<vmem>>
      %89 = tpu.memref_squeeze %88 : memref<1x1x128xf32, #tpu.memory_space<vmem>> -> memref<1x128xf32, #tpu.memory_space<vmem>>
      %90 = tpu.memref_slice %arg9[%c1_i32_52, %c0_i32_53] : memref<2x2x!tpu.dma_semaphore, #tpu.memory_space<semaphore_mem>> -> memref<1x1x!tpu.dma_semaphore, #tpu.memory_space<semaphore_mem>>
      %91 = tpu.memref_squeeze %90 : memref<1x1x!tpu.dma_semaphore, #tpu.memory_space<semaphore_mem>> -> memref<!tpu.dma_semaphore, #tpu.memory_space<semaphore_mem>>
      tpu.enqueue_dma source(%87 : memref<1x128xf32, #tpu.memory_space<any>>) target(%89 : memref<1x128xf32, #tpu.memory_space<vmem>>) target_semaphore(%91 : memref<!tpu.dma_semaphore, #tpu.memory_space<semaphore_mem>>)
    }
    %c8_i32_4 = arith.constant 8 : i32
    %c8_i32_5 = arith.constant 8 : i32
    %6 = arith.addi %0, %c8_i32_5 : i32
    %c0_i32_6 = arith.constant 0 : i32
    %c8_i32_7 = arith.constant 8 : i32
    %7 = arith.addi %c0_i32_6, %c8_i32_7 : i32
    %c1_i32_8 = arith.constant 1 : i32
    scf.for %arg10 = %c0_i32_6 to %7 step %c1_i32_8  : i32 {
      %c1_i32_44 = arith.constant 1 : i32
      %74 = arith.muli %arg10, %c1_i32_44 : i32
      %c0_i32_45 = arith.constant 0 : i32
      %75 = arith.addi %c0_i32_45, %74 : i32
      %76 = arith.addi %6, %75 : i32
      %77 = arith.index_cast %76 : i32 to index
      %78 = memref.load %arg1[%77] : memref<32xi32, #tpu.memory_space<smem>>
      %79 = arith.addi %6, %75 : i32
      %80 = arith.index_cast %79 : i32 to index
      %81 = memref.load %arg2[%80] : memref<32xi32, #tpu.memory_space<smem>>
      %c1_i32_46 = arith.constant 1 : i32
      %c0_i32_47 = arith.constant 0 : i32
      %c1_i32_48 = arith.constant 1 : i32
      %c0_i32_49 = arith.constant 0 : i32
      %82 = tpu.memref_slice %arg3[%78, %c0_i32_49] : memref<64x128xf32, #tpu.memory_space<any>> -> memref<1x128xf32, #tpu.memory_space<any>>
      %c0_i32_50 = arith.constant 0 : i32
      %83 = tpu.memref_slice %arg7[%c1_i32_46, %75, %c0_i32_50] : memref<2x8x128xf32, #tpu.memory_space<vmem>> -> memref<1x1x128xf32, #tpu.memory_space<vmem>>
      %84 = tpu.memref_squeeze %83 : memref<1x1x128xf32, #tpu.memory_space<vmem>> -> memref<1x128xf32, #tpu.memory_space<vmem>>
      %85 = tpu.memref_slice %arg9[%c0_i32_47, %c1_i32_48] : memref<2x2x!tpu.dma_semaphore, #tpu.memory_space<semaphore_mem>> -> memref<1x1x!tpu.dma_semaphore, #tpu.memory_space<semaphore_mem>>
      %86 = tpu.memref_squeeze %85 : memref<1x1x!tpu.dma_semaphore, #tpu.memory_space<semaphore_mem>> -> memref<!tpu.dma_semaphore, #tpu.memory_space<semaphore_mem>>
      tpu.enqueue_dma source(%82 : memref<1x128xf32, #tpu.memory_space<any>>) target(%84 : memref<1x128xf32, #tpu.memory_space<vmem>>) target_semaphore(%86 : memref<!tpu.dma_semaphore, #tpu.memory_space<semaphore_mem>>)
      %c1_i32_51 = arith.constant 1 : i32
      %c1_i32_52 = arith.constant 1 : i32
      %c1_i32_53 = arith.constant 1 : i32
      %c0_i32_54 = arith.constant 0 : i32
      %87 = tpu.memref_slice %arg4[%81, %c0_i32_54] : memref<64x128xf32, #tpu.memory_space<any>> -> memref<1x128xf32, #tpu.memory_space<any>>
      %c0_i32_55 = arith.constant 0 : i32
      %88 = tpu.memref_slice %arg8[%c1_i32_51, %75, %c0_i32_55] : memref<2x8x128xf32, #tpu.memory_space<vmem>> -> memref<1x1x128xf32, #tpu.memory_space<vmem>>
      %89 = tpu.memref_squeeze %88 : memref<1x1x128xf32, #tpu.memory_space<vmem>> -> memref<1x128xf32, #tpu.memory_space<vmem>>
      %90 = tpu.memref_slice %arg9[%c1_i32_52, %c1_i32_53] : memref<2x2x!tpu.dma_semaphore, #tpu.memory_space<semaphore_mem>> -> memref<1x1x!tpu.dma_semaphore, #tpu.memory_space<semaphore_mem>>
      %91 = tpu.memref_squeeze %90 : memref<1x1x!tpu.dma_semaphore, #tpu.memory_space<semaphore_mem>> -> memref<!tpu.dma_semaphore, #tpu.memory_space<semaphore_mem>>
      tpu.enqueue_dma source(%87 : memref<1x128xf32, #tpu.memory_space<any>>) target(%89 : memref<1x128xf32, #tpu.memory_space<vmem>>) target_semaphore(%91 : memref<!tpu.dma_semaphore, #tpu.memory_space<semaphore_mem>>)
    }
    %c8_i32_9 = arith.constant 8 : i32
    %c0_i32_10 = arith.constant 0 : i32
    %c8_i32_11 = arith.constant 8 : i32
    %8 = arith.addi %c0_i32_10, %c8_i32_11 : i32
    %c1_i32_12 = arith.constant 1 : i32
    scf.for %arg10 = %c0_i32_10 to %8 step %c1_i32_12  : i32 {
      %c1_i32_44 = arith.constant 1 : i32
      %74 = arith.muli %arg10, %c1_i32_44 : i32
      %c0_i32_45 = arith.constant 0 : i32
      %75 = arith.addi %c0_i32_45, %74 : i32
      %c0_i32_46 = arith.constant 0 : i32
      %c0_i32_47 = arith.constant 0 : i32
      %c0_i32_48 = arith.constant 0 : i32
      %c0_i32_49 = arith.constant 0 : i32
      %c0_i32_50 = arith.constant 0 : i32
      %76 = tpu.memref_slice %arg3[%c0_i32_49, %c0_i32_50] : memref<64x128xf32, #tpu.memory_space<any>> -> memref<1x128xf32, #tpu.memory_space<any>>
      %c0_i32_51 = arith.constant 0 : i32
      %77 = tpu.memref_slice %arg7[%c0_i32_46, %75, %c0_i32_51] : memref<2x8x128xf32, #tpu.memory_space<vmem>> -> memref<1x1x128xf32, #tpu.memory_space<vmem>>
      %78 = tpu.memref_squeeze %77 : memref<1x1x128xf32, #tpu.memory_space<vmem>> -> memref<1x128xf32, #tpu.memory_space<vmem>>
      %79 = tpu.memref_slice %arg9[%c0_i32_47, %c0_i32_48] : memref<2x2x!tpu.dma_semaphore, #tpu.memory_space<semaphore_mem>> -> memref<1x1x!tpu.dma_semaphore, #tpu.memory_space<semaphore_mem>>
      %80 = tpu.memref_squeeze %79 : memref<1x1x!tpu.dma_semaphore, #tpu.memory_space<semaphore_mem>> -> memref<!tpu.dma_semaphore, #tpu.memory_space<semaphore_mem>>
      tpu.wait_dma2 semaphore(%80 : memref<!tpu.dma_semaphore, #tpu.memory_space<semaphore_mem>>) src(%76 : memref<1x128xf32, #tpu.memory_space<any>>) dst(%78 : memref<1x128xf32, #tpu.memory_space<vmem>>)
      %c0_i32_52 = arith.constant 0 : i32
      %c1_i32_53 = arith.constant 1 : i32
      %c0_i32_54 = arith.constant 0 : i32
      %c0_i32_55 = arith.constant 0 : i32
      %c0_i32_56 = arith.constant 0 : i32
      %81 = tpu.memref_slice %arg4[%c0_i32_55, %c0_i32_56] : memref<64x128xf32, #tpu.memory_space<any>> -> memref<1x128xf32, #tpu.memory_space<any>>
      %c0_i32_57 = arith.constant 0 : i32
      %82 = tpu.memref_slice %arg8[%c0_i32_52, %75, %c0_i32_57] : memref<2x8x128xf32, #tpu.memory_space<vmem>> -> memref<1x1x128xf32, #tpu.memory_space<vmem>>
      %83 = tpu.memref_squeeze %82 : memref<1x1x128xf32, #tpu.memory_space<vmem>> -> memref<1x128xf32, #tpu.memory_space<vmem>>
      %84 = tpu.memref_slice %arg9[%c1_i32_53, %c0_i32_54] : memref<2x2x!tpu.dma_semaphore, #tpu.memory_space<semaphore_mem>> -> memref<1x1x!tpu.dma_semaphore, #tpu.memory_space<semaphore_mem>>
      %85 = tpu.memref_squeeze %84 : memref<1x1x!tpu.dma_semaphore, #tpu.memory_space<semaphore_mem>> -> memref<!tpu.dma_semaphore, #tpu.memory_space<semaphore_mem>>
      tpu.wait_dma2 semaphore(%85 : memref<!tpu.dma_semaphore, #tpu.memory_space<semaphore_mem>>) src(%81 : memref<1x128xf32, #tpu.memory_space<any>>) dst(%83 : memref<1x128xf32, #tpu.memory_space<vmem>>)
    }
    %c8_i32_13 = arith.constant 8 : i32
    %c0_14 = arith.constant 0 : index
    %c0_15 = arith.constant 0 : index
    %c0_16 = arith.constant 0 : index
    %9 = vector.load %arg7[%c0_14, %c0_15, %c0_16] : memref<2x8x128xf32, #tpu.memory_space<vmem>>, vector<1x8x128xf32>
    %10 = vector.shape_cast %9 : vector<1x8x128xf32> to vector<8x128xf32>
    %c0_17 = arith.constant 0 : index
    %c0_18 = arith.constant 0 : index
    %c0_19 = arith.constant 0 : index
    %11 = vector.load %arg8[%c0_17, %c0_18, %c0_19] : memref<2x8x128xf32, #tpu.memory_space<vmem>>, vector<1x8x128xf32>
    %12 = vector.shape_cast %11 : vector<1x8x128xf32> to vector<8x128xf32>
    %13 = arith.addf %10, %12 : vector<8x128xf32>
    %14 = vector.broadcast %1 : vector<1x128xf32> to vector<8x128xf32>
    %15 = arith.addf %13, %14 : vector<8x128xf32>
    %cst = arith.constant dense<0.000000e+00> : vector<8xf32>
    %16 = vector.multi_reduction <add>, %15, %cst [1] : vector<8x128xf32> to vector<8xf32>
    %17 = vector.shape_cast %16 : vector<8xf32> to vector<8x1xf32>
    %18 = arith.mulf %15, %15 : vector<8x128xf32>
    %cst_20 = arith.constant dense<0.000000e+00> : vector<8xf32>
    %19 = vector.multi_reduction <add>, %18, %cst_20 [1] : vector<8x128xf32> to vector<8xf32>
    %20 = vector.shape_cast %19 : vector<8xf32> to vector<8x1xf32>
    %cst_21 = arith.constant 7.812500e-03 : f32
    %21 = vector.broadcast %cst_21 : f32 to vector<8x1xf32>
    %22 = arith.mulf %17, %21 : vector<8x1xf32>
    %cst_22 = arith.constant 7.812500e-03 : f32
    %23 = vector.broadcast %cst_22 : f32 to vector<8x1xf32>
    %24 = arith.mulf %20, %23 : vector<8x1xf32>
    %25 = arith.mulf %22, %22 : vector<8x1xf32>
    %26 = arith.subf %24, %25 : vector<8x1xf32>
    %cst_23 = arith.constant 0.000000e+00 : f32
    %27 = vector.broadcast %cst_23 : f32 to vector<8x1xf32>
    %28 = arith.maximumf %26, %27 : vector<8x1xf32>
    %29 = vector.broadcast %22 : vector<8x1xf32> to vector<8x128xf32>
    %30 = arith.subf %15, %29 : vector<8x128xf32>
    %cst_24 = arith.constant 9.99999996E-13 : f32
    %31 = vector.broadcast %cst_24 : f32 to vector<8x1xf32>
    %32 = arith.addf %28, %31 : vector<8x1xf32>
    %33 = math.rsqrt %32 : vector<8x1xf32>
    %34 = vector.broadcast %33 : vector<8x1xf32> to vector<8x128xf32>
    %35 = arith.mulf %30, %34 : vector<8x128xf32>
    %36 = vector.broadcast %2 : vector<1x128xf32> to vector<8x128xf32>
    %37 = arith.mulf %35, %36 : vector<8x128xf32>
    %38 = vector.broadcast %3 : vector<1x128xf32> to vector<8x128xf32>
    %39 = arith.addf %37, %38 : vector<8x128xf32>
    %c0_25 = arith.constant 0 : index
    %c0_26 = arith.constant 0 : index
    %40 = vector.load %arg6[%c0_25, %c0_26] : memref<16x128xf32, #tpu.memory_space<vmem>>, vector<8x128xf32>
    tpu.vector_store %arg6[%c0_25, %c0_26], %39 {strides = array<i32>} : memref<16x128xf32, #tpu.memory_space<vmem>>, vector<8x128xf32>,
    %c0_i32_27 = arith.constant 0 : i32
    %c8_i32_28 = arith.constant 8 : i32
    %41 = arith.addi %c0_i32_27, %c8_i32_28 : i32
    %c1_i32_29 = arith.constant 1 : i32
    scf.for %arg10 = %c0_i32_27 to %41 step %c1_i32_29  : i32 {
      %c1_i32_44 = arith.constant 1 : i32
      %74 = arith.muli %arg10, %c1_i32_44 : i32
      %c0_i32_45 = arith.constant 0 : i32
      %75 = arith.addi %c0_i32_45, %74 : i32
      %c1_i32_46 = arith.constant 1 : i32
      %c0_i32_47 = arith.constant 0 : i32
      %c1_i32_48 = arith.constant 1 : i32
      %c0_i32_49 = arith.constant 0 : i32
      %c0_i32_50 = arith.constant 0 : i32
      %76 = tpu.memref_slice %arg3[%c0_i32_49, %c0_i32_50] : memref<64x128xf32, #tpu.memory_space<any>> -> memref<1x128xf32, #tpu.memory_space<any>>
      %c0_i32_51 = arith.constant 0 : i32
      %77 = tpu.memref_slice %arg7[%c1_i32_46, %75, %c0_i32_51] : memref<2x8x128xf32, #tpu.memory_space<vmem>> -> memref<1x1x128xf32, #tpu.memory_space<vmem>>
      %78 = tpu.memref_squeeze %77 : memref<1x1x128xf32, #tpu.memory_space<vmem>> -> memref<1x128xf32, #tpu.memory_space<vmem>>
      %79 = tpu.memref_slice %arg9[%c0_i32_47, %c1_i32_48] : memref<2x2x!tpu.dma_semaphore, #tpu.memory_space<semaphore_mem>> -> memref<1x1x!tpu.dma_semaphore, #tpu.memory_space<semaphore_mem>>
      %80 = tpu.memref_squeeze %79 : memref<1x1x!tpu.dma_semaphore, #tpu.memory_space<semaphore_mem>> -> memref<!tpu.dma_semaphore, #tpu.memory_space<semaphore_mem>>
      tpu.wait_dma2 semaphore(%80 : memref<!tpu.dma_semaphore, #tpu.memory_space<semaphore_mem>>) src(%76 : memref<1x128xf32, #tpu.memory_space<any>>) dst(%78 : memref<1x128xf32, #tpu.memory_space<vmem>>)
      %c1_i32_52 = arith.constant 1 : i32
      %c1_i32_53 = arith.constant 1 : i32
      %c1_i32_54 = arith.constant 1 : i32
      %c0_i32_55 = arith.constant 0 : i32
      %c0_i32_56 = arith.constant 0 : i32
      %81 = tpu.memref_slice %arg4[%c0_i32_55, %c0_i32_56] : memref<64x128xf32, #tpu.memory_space<any>> -> memref<1x128xf32, #tpu.memory_space<any>>
      %c0_i32_57 = arith.constant 0 : i32
      %82 = tpu.memref_slice %arg8[%c1_i32_52, %75, %c0_i32_57] : memref<2x8x128xf32, #tpu.memory_space<vmem>> -> memref<1x1x128xf32, #tpu.memory_space<vmem>>
      %83 = tpu.memref_squeeze %82 : memref<1x1x128xf32, #tpu.memory_space<vmem>> -> memref<1x128xf32, #tpu.memory_space<vmem>>
      %84 = tpu.memref_slice %arg9[%c1_i32_53, %c1_i32_54] : memref<2x2x!tpu.dma_semaphore, #tpu.memory_space<semaphore_mem>> -> memref<1x1x!tpu.dma_semaphore, #tpu.memory_space<semaphore_mem>>
      %85 = tpu.memref_squeeze %84 : memref<1x1x!tpu.dma_semaphore, #tpu.memory_space<semaphore_mem>> -> memref<!tpu.dma_semaphore, #tpu.memory_space<semaphore_mem>>
      tpu.wait_dma2 semaphore(%85 : memref<!tpu.dma_semaphore, #tpu.memory_space<semaphore_mem>>) src(%81 : memref<1x128xf32, #tpu.memory_space<any>>) dst(%83 : memref<1x128xf32, #tpu.memory_space<vmem>>)
    }
    %c8_i32_30 = arith.constant 8 : i32
    %c1_31 = arith.constant 1 : index
    %c0_32 = arith.constant 0 : index
    %c0_33 = arith.constant 0 : index
    %42 = vector.load %arg7[%c1_31, %c0_32, %c0_33] : memref<2x8x128xf32, #tpu.memory_space<vmem>>, vector<1x8x128xf32>
    %43 = vector.shape_cast %42 : vector<1x8x128xf32> to vector<8x128xf32>
    %c1_34 = arith.constant 1 : index
    %c0_35 = arith.constant 0 : index
    %c0_36 = arith.constant 0 : index
    %44 = vector.load %arg8[%c1_34, %c0_35, %c0_36] : memref<2x8x128xf32, #tpu.memory_space<vmem>>, vector<1x8x128xf32>
    %45 = vector.shape_cast %44 : vector<1x8x128xf32> to vector<8x128xf32>
    %46 = arith.addf %43, %45 : vector<8x128xf32>
    %47 = vector.broadcast %1 : vector<1x128xf32> to vector<8x128xf32>
    %48 = arith.addf %46, %47 : vector<8x128xf32>
    %cst_37 = arith.constant dense<0.000000e+00> : vector<8xf32>
    %49 = vector.multi_reduction <add>, %48, %cst_37 [1] : vector<8x128xf32> to vector<8xf32>
    %50 = vector.shape_cast %49 : vector<8xf32> to vector<8x1xf32>
    %51 = arith.mulf %48, %48 : vector<8x128xf32>
    %cst_38 = arith.constant dense<0.000000e+00> : vector<8xf32>
    %52 = vector.multi_reduction <add>, %51, %cst_38 [1] : vector<8x128xf32> to vector<8xf32>
    %53 = vector.shape_cast %52 : vector<8xf32> to vector<8x1xf32>
    %cst_39 = arith.constant 7.812500e-03 : f32
    %54 = vector.broadcast %cst_39 : f32 to vector<8x1xf32>
    %55 = arith.mulf %50, %54 : vector<8x1xf32>
    %cst_40 = arith.constant 7.812500e-03 : f32
    %56 = vector.broadcast %cst_40 : f32 to vector<8x1xf32>
    %57 = arith.mulf %53, %56 : vector<8x1xf32>
    %58 = arith.mulf %55, %55 : vector<8x1xf32>
    %59 = arith.subf %57, %58 : vector<8x1xf32>
    %cst_41 = arith.constant 0.000000e+00 : f32
    %60 = vector.broadcast %cst_41 : f32 to vector<8x1xf32>
    %61 = arith.maximumf %59, %60 : vector<8x1xf32>
    %62 = vector.broadcast %55 : vector<8x1xf32> to vector<8x128xf32>
    %63 = arith.subf %48, %62 : vector<8x128xf32>
    %cst_42 = arith.constant 9.99999996E-13 : f32
    %64 = vector.broadcast %cst_42 : f32 to vector<8x1xf32>
    %65 = arith.addf %61, %64 : vector<8x1xf32>
    %66 = math.rsqrt %65 : vector<8x1xf32>
    %67 = vector.broadcast %66 : vector<8x1xf32> to vector<8x128xf32>
    %68 = arith.mulf %63, %67 : vector<8x128xf32>
    %69 = vector.broadcast %2 : vector<1x128xf32> to vector<8x128xf32>
    %70 = arith.mulf %68, %69 : vector<8x128xf32>
    %71 = vector.broadcast %3 : vector<1x128xf32> to vector<8x128xf32>
    %72 = arith.addf %70, %71 : vector<8x128xf32>
    %c8 = arith.constant 8 : index
    %c0_43 = arith.constant 0 : index
    %73 = vector.load %arg6[%c8, %c0_43] : memref<16x128xf32, #tpu.memory_space<vmem>>, vector<8x128xf32>
    tpu.vector_store %arg6[%c8, %c0_43], %72 {strides = array<i32>} : memref<16x128xf32, #tpu.memory_space<vmem>>, vector<8x128xf32>,
    return
  }
  func.func @transform_2(%arg0: i32, %arg1: memref<32xi32, #tpu.memory_space<smem>>, %arg2: memref<32xi32, #tpu.memory_space<smem>>) -> (i32, i32) {
    %c0_i32 = arith.constant 0 : i32
    %c0_i32_0 = arith.constant 0 : i32
    %c0_i32_1 = arith.constant 0 : i32
    return %c0_i32, %c0_i32_0 : i32, i32
  }
  func.func @transform_3(%arg0: i32, %arg1: memref<32xi32, #tpu.memory_space<smem>>, %arg2: memref<32xi32, #tpu.memory_space<smem>>) -> (i32, i32) {
    %c0_i32 = arith.constant 0 : i32
    %c0_i32_0 = arith.constant 0 : i32
    return %arg0, %c0_i32 : i32, i32
  }
}

</mosaic_0001>

<bundles_post_ra>
// kernel: tpu_custom_call.1
= control target key start
LH: loop header
LB: loop body
LE: loop exit
PB: predicated region body
PF: predicated region fallthrough
CT: control target
= control target key end

     0   :  { %s807_s24 = smov [#allocation6]   ;;  %s808_s25 = smov [#allocation7]   ;;  %s1050_s0 = inlined_call_operand.hbm [shape: s32[32], index: 0, kind: input, shape index: {}]   ;;  %s1051_s2 = inlined_call_operand.hbm [shape: f32[64,128], index: 2, kind: input, shape index: {}]   ;;  %s1052_s3 = inlined_call_operand.hbm [shape: f32[64,128], index: 3, kind: input, shape index: {}]   ;;  %s1053_s4 = inlined_call_operand.hbm [shape: f32[8,128], index: 4, kind: input, shape index: {}]   ;;  %s1054_s5 = inlined_call_operand.hbm [shape: f32[32,128], index: 5, kind: output, shape index: {}]   ;;  %s1055_s1 = inlined_call_operand.hbm [shape: s32[32], index: 1, kind: input, shape index: {}]  }
   0x1   :  { %1060 = sst [smem:[#allocation31_spill]] %s1053_s4  ;;  %s11_s20 = sshll.u32 %s1050_s0, 4  ;;  %s12_s20 = int_to_ptr.hbm [resolvable:$true] %s11_s20 }
   0x2   :  { %s16_s23 = sshll.u32 %s1055_s1, 4  ;;  %s17_s23 = int_to_ptr.hbm [resolvable:$true] %s16_s23 }
   0x3   :  { %14 = dma.hbm_to_smem %s12_s20, 16, %s807_s24, [#allocation5] }
   0x4   :  { %19 = dma.hbm_to_smem %s17_s23, 16, %s808_s25, [#allocation5] }
   0x5   :  { %757 = dma.done.wait [#allocation5], 32 }
   0x6   :  { %758 = vsyncadd [#allocation5], 4294967264 }
   0x7   :  { %22 = sfence }
   0x8   :  { %23 = vsyncpa [#allocation9], 0 }
   0x9   :  { %24 = vsyncpa [#allocation10], 0 }
   0xa   :  { %26 = vsyncpa [#allocation10 + $0x1], 0  ;;  %s850_s26 = smov 0   ;;  %s852_s27 = smov 0  }
   0xb   :  { %s854_s0 = smov 0   ;;  %s856_s28 = smov 0  }
   0xc LB: > { %1061 = sst [smem:[#allocation29_spill]] %s785_s0  ;;  %s439_s1 = sadd.s32 4294967295, %s789_s28   ;;  %s789_s28 = sphi %s856_s28, %s1074_s28   ;;  %s785_s0 = sphi %s854_s0, %s1071_s0   ;;  %s781_s27 = sphi %s852_s27, %s1073_s27   ;;  %s777_s26 = sphi %s850_s26, %s1072_s26  }
   0xd   : > { %s440_s29 = sadd.s32 4294967294, %s789_s28   ;;  %s873_s30 = sadd.s32 1, %s789_s28  }
   0xe   : > { %s60_s6 = sadd.s32 1, %s785_s0  ;;  %s57_s7 = ssub.s32 %s789_s28, %s873_s30 }
   0xf   : > { %p70_p0 = scmp.ne.s32.totalorder %s785_s0, %s781_s27  ;;  %p58_p1 = scmp.eq.s32.totalorder %s57_s7, 0 }
  0x10   : > { %p71_p2 = scmp.eq.s32.totalorder %s439_s1, 1  ;;  %p76_p3 = scmp.ne.s32.totalorder %s781_s27, %s777_s26 }
  0x11   : > { %p77_p4 = scmp.eq.s32.totalorder %s440_s29, 1  ;;  %p441_p7 = scmp.ge.s32.totalorder %s789_s28, 1 }
  0x12   : > { %s883_s8 = scalar_select %p58_p1, %s785_s0, %s60_s6  }
  0x13   : > { %p885_p5 = por %p71_p2, %p70_p0  ;;  %p889_p6 = por %p77_p4, %p76_p3 }
  0x14   : > { %1062 = sst [smem:[#allocation30_spill]] %s883_s8  ;;  %p84_p8 = scmp.lt.s32.totalorder %s789_s28, 3 }
  0x15   : > { %p471_p9 = scmp.eq.s32.totalorder %s439_s1, 0  ;;  %s1065_s4 = sld [smem:[#allocation31_spill]] }
  0x16   : > { %p85_p10 = pnand %p441_p7, %p84_p8  ;;  %s809_s14 = smov [#allocation8]  }
  0x17   : > { %s98_s15 = sshll.u32 %s809_s14, 4  ;;  %s99_s15 = int_to_ptr.vmem [resolvable:$true] %s98_s15 }
  0x18   : > { %p463_p11 = pneg %p85_p10  ;;  %111 = sbr.rel (%p85_p10) target bundleno = 483 (0x1e3), region = 24 }
  0x1a   : > { %p464_p12 = pnand %p471_p9, %p463_p11 }
  0x1b   : > { %s96_s13 = sshll.u32 %s1065_s4, 4  ;;  %s97_s13 = int_to_ptr.hbm [resolvable:$true] %s96_s13 }
  0x1c   : > { %466 = dma.hbm_to_vmem [thread:$0]  (!%p464_p12), %s97_s13, 128, %s99_s15, [#allocation9]  }
  0x1d   : > { %760 = dma.done.wait (%p471_p9), [#allocation9], 128  }
  0x1e   : > { %762 = vsyncadd (%p471_p9), [#allocation9], 4294967168  ;;  %s1056_s16 = sand.u32 1, %s781_s27   ;;  %s899_s17 = sshll.u32 %s439_s1, 4  ;;  %v903_v0 = vld [vmem:[#allocation8] sm:$0x1] }
  0x1f   : > { %s445_s18 = sshll.u32 %s1056_s16, 4  ;;  %v905_v1 = vld [vmem:[#allocation8 + $0x1] sm:$0x1]  ;;  %v907_v2 = vld [vmem:[#allocation8 + $0x2] sm:$0x1]  ;;  %s911_s20 = smov 0  }
  0x20   : > { %s909_s19 = scalar_lea.vmem [#allocation11], %s445_s18 }
  0x21 LB: >> { %s138_s21 = sadd.s32 %s793_s20, %s899_s17  ;;  %s142_s24 = scalar_lea.vmem [#allocation2], %s793_s20  ;;  %s793_s20 = sphi %s911_s20, %s137_s20  }
  0x22   : >> { %s139_s22 = sld [smem:[#allocation6 + %s138_s21]]  ;;  %s919_s25 = sshll.u32 %s142_s24, 4  ;;  %s153_s25 = int_to_ptr.vmem [resolvable:$true] %s919_s25 }
  0x23   : >> { %s140_s23 = sld [smem:[#allocation7 + %s138_s21]]  ;;  %s157_s1 = scalar_lea.vmem [#allocation3], %s793_s20 }
  0x24   : >> { %s922_s29 = sshll.u32 %s157_s1, 4  ;;  %s1058_s4 = scalar_lea.hbm %s1051_s2, 64  ;;  %s169_s29 = int_to_ptr.vmem [resolvable:$true] %s922_s29 }
  0x28   : >> { %s141_s11 = scalar_lea.hbm %s1051_s2, %s139_s22 }
  0x29   : >> { %s150_s12 = sshll.u32 %s141_s11, 4  ;;  %s156_s15 = scalar_lea.hbm %s1052_s3, %s140_s23  ;;  %s151_s12 = int_to_ptr.hbm [resolvable:$true] %s150_s12 }
  0x2a   : >> { %s932_s18 = sshll.u32 %s156_s15, 4  ;;  %s601_s21 = sshra.s32 %s151_s12, 4  ;;  %s602_s21 = int_to_ptr.hbm [resolvable:$true] %s601_s21  ;;  %s167_s18 = int_to_ptr.hbm [resolvable:$true] %s932_s18 }
  0x2b   : >> { %s603_s24 = scalar_lea.hbm %s602_s21, 1  ;;  %p606_p0 = scmp.lt.s32.totalorder %s602_s21, %s1051_s2 }
  0x2c   : >> { %p604_p13 = scmp.ne.s32.totalorder %s602_s21, %s603_s24  ;;  %p607_p1 = scmp.lt.s32.totalorder %s1058_s4, %s603_s24 }
  0x2e   : >> { %p608_p2 = por %p607_p1, %p606_p0 }
  0x30   : >> { %p609_p3 = pnand %p608_p2, %p604_p13 }
  0x32   : >> { %612 = shalt.err (!%p609_p3)  }
  0x33   : >> { %s613_s23 = sshra.s32 %s153_s25, 4  ;;  %s810_s13 = smov [#allocation2]   ;;  %s614_s23 = int_to_ptr.vmem [resolvable:$true] %s613_s23 }
  0x34   : >> { %s615_s11 = scalar_lea.vmem %s614_s23, 1  ;;  %s944_s14 = scalar_lea.vmem %s810_s13, 16 }
  0x35   : >> { %p616_p4 = scmp.ne.s32.totalorder %s614_s23, %s615_s11  ;;  %p618_p7 = scmp.lt.s32.totalorder %s614_s23, [#allocation2] }
  0x36   : >> { %p619_p8 = scmp.lt.s32.totalorder %s944_s14, %s615_s11 }
  0x38   : >> { %p620_p9 = por %p619_p8, %p618_p7 }
  0x3a   : >> { %p621_p10 = pnand %p620_p9, %p616_p4 }
  0x3c   : >> { %624 = shalt.err (!%p621_p10)  }
  0x3d   : >> { %155 = dma.hbm_to_vmem [thread:$0]  %s151_s12, 16, %s153_s25, [#allocation4] }
  0x3e   : >> { %s625_s8 = sshra.s32 %s167_s18, 4  ;;  %s1057_s24 = scalar_lea.hbm %s1052_s3, 64  ;;  %s626_s8 = int_to_ptr.hbm [resolvable:$true] %s625_s8 }
  0x3f   : >> { %s627_s16 = scalar_lea.hbm %s626_s8, 1  ;;  %p630_p12 = scmp.lt.s32.totalorder %s626_s8, %s1052_s3 }
  0x40   : >> { %p628_p11 = scmp.ne.s32.totalorder %s626_s8, %s627_s16  ;;  %p631_p13 = scmp.lt.s32.totalorder %s1057_s24, %s627_s16 }
  0x42   : >> { %p632_p0 = por %p631_p13, %p630_p12 }
  0x44   : >> { %p633_p1 = pnand %p632_p0, %p628_p11 }
  0x46   : >> { %636 = shalt.err (!%p633_p1)  }
  0x47   : >> { %s637_s25 = sshra.s32 %s169_s29, 4  ;;  %s811_s23 = smov [#allocation3]   ;;  %s638_s25 = int_to_ptr.vmem [resolvable:$true] %s637_s25 }
  0x48   : >> { %s639_s12 = scalar_lea.vmem %s638_s25, 1  ;;  %s960_s11 = scalar_lea.vmem %s811_s23, 16 }
  0x49   : >> { %p640_p2 = scmp.ne.s32.totalorder %s638_s25, %s639_s12  ;;  %p642_p3 = scmp.lt.s32.totalorder %s638_s25, [#allocation3] }
  0x4a   : >> { %p643_p4 = scmp.lt.s32.totalorder %s960_s11, %s639_s12 }
  0x4c   : >> { %p644_p7 = por %p643_p4, %p642_p3 }
  0x4e   : >> { %p645_p8 = pnand %p644_p7, %p640_p2 }
  0x50   : >> { %648 = shalt.err (!%p645_p8)  }
  0x51   : >> { %171 = dma.hbm_to_vmem [thread:$0]  %s167_s18, 16, %s169_s29, [#allocation4 + $0x2] }
  0x52   : >> { %s137_s20 = sadd.s32 1, %s793_s20  }
  0x53   : >> { %p134_p9 = scmp.ge.s32.totalorder %s137_s20, 8  }
  0x54   : > { %s969_s8 = smov (%p134_p9), 0  }
  0x55   : > { %136 = sbr.rel (!%p134_p9) target bundleno = 33 (0x21), region = 124 }
  0x5a LB: >> { %s1066_s13 = sadd.s32 8, %s899_s17  ;;  %s383_s16 = scalar_lea.vmem [#allocation2], %s797_s8  ;;  %s797_s8 = sphi %s969_s8, %s178_s8  }
  0x5b   : >> { %s179_s29 = sadd.s32 %s797_s8, %s1066_s13  ;;  %s384_s15 = scalar_lea.vmem %s383_s16, 8 [#allocation2] }
  0x5c   : >> { %s180_s18 = sld [smem:[#allocation6 + %s179_s29]]  ;;  %s195_s21 = sshll.u32 %s384_s15, 4  ;;  %s196_s21 = int_to_ptr.vmem [resolvable:$true] %s195_s21 }
  0x5d   : >> { %s181_s20 = sld [smem:[#allocation7 + %s179_s29]]  ;;  %s386_s1 = scalar_lea.vmem [#allocation3], %s797_s8 }
  0x5e   : >> { %s387_s6 = scalar_lea.vmem %s386_s1, 8 [#allocation3]  ;;  %s1067_s7 = scalar_lea.hbm %s1051_s2, 64 }
  0x5f   : >> { %s211_s22 = sshll.u32 %s387_s6, 4  ;;  %s982_s22 = int_to_ptr.vmem [resolvable:$true] %s211_s22 }
  0x62   : >> { %s182_s12 = scalar_lea.hbm %s1051_s2, %s180_s18 }
  0x63   : >> { %s193_s23 = sshll.u32 %s182_s12, 4  ;;  %s199_s13 = scalar_lea.hbm %s1052_s3, %s181_s20  ;;  %s194_s23 = int_to_ptr.hbm [resolvable:$true] %s193_s23 }
  0x64   : >> { %s987_s0 = sshll.u32 %s199_s13, 4  ;;  %s649_s29 = sshra.s32 %s194_s23, 4  ;;  %s650_s29 = int_to_ptr.hbm [resolvable:$true] %s649_s29  ;;  %s210_s0 = int_to_ptr.hbm [resolvable:$true] %s987_s0 }
  0x65   : >> { %s651_s16 = scalar_lea.hbm %s650_s29, 1  ;;  %p654_p11 = scmp.lt.s32.totalorder %s650_s29, %s1051_s2 }
  0x66   : >> { %p652_p10 = scmp.ne.s32.totalorder %s650_s29, %s651_s16  ;;  %p655_p12 = scmp.lt.s32.totalorder %s1067_s7, %s651_s16 }
  0x68   : >> { %p656_p13 = por %p655_p12, %p654_p11 }
  0x6a   : >> { %p657_p0 = pnand %p656_p13, %p652_p10 }
  0x6c   : >> { %660 = shalt.err (!%p657_p0)  }
  0x6d   : >> { %s661_s4 = sshra.s32 %s196_s21, 4  ;;  %s662_s4 = int_to_ptr.vmem [resolvable:$true] %s661_s4 }
  0x6e   : >> { %s663_s24 = scalar_lea.vmem %s662_s4, 1  ;;  %p666_p2 = scmp.lt.s32.totalorder %s662_s4, [#allocation2] }
  0x6f   : >> { %p664_p1 = scmp.ne.s32.totalorder %s662_s4, %s663_s24  ;;  %p667_p3 = scmp.lt.s32.totalorder %s944_s14, %s663_s24 }
  0x71   : >> { %p668_p4 = por %p667_p3, %p666_p2 }
  0x73   : >> { %p669_p7 = pnand %p668_p4, %p664_p1 }
  0x75   : >> { %672 = shalt.err (!%p669_p7)  }
  0x76   : >> { %198 = dma.hbm_to_vmem [thread:$0]  %s194_s23, 16, %s196_s21, [#allocation4 + $0x1] }
  0x77   : >> { %s673_s13 = sshra.s32 %s210_s0, 4  ;;  %s1068_s15 = scalar_lea.hbm %s1052_s3, 64  ;;  %s674_s13 = int_to_ptr.hbm [resolvable:$true] %s673_s13 }
  0x78   : >> { %s675_s20 = scalar_lea.hbm %s674_s13, 1  ;;  %p678_p9 = scmp.lt.s32.totalorder %s674_s13, %s1052_s3 }
  0x79   : >> { %p676_p8 = scmp.ne.s32.totalorder %s674_s13, %s675_s20  ;;  %p679_p10 = scmp.lt.s32.totalorder %s1068_s15, %s675_s20 }
  0x7b   : >> { %p680_p11 = por %p679_p10, %p678_p9 }
  0x7d   : >> { %p681_p12 = pnand %p680_p11, %p676_p8 }
  0x7f   : >> { %684 = shalt.err (!%p681_p12)  }
  0x80   : >> { %s685_s21 = sshra.s32 %s982_s22, 4  ;;  %s686_s21 = int_to_ptr.vmem [resolvable:$true] %s685_s21 }
  0x81   : >> { %s687_s23 = scalar_lea.vmem %s686_s21, 1  ;;  %p690_p0 = scmp.lt.s32.totalorder %s686_s21, [#allocation3] }
  0x82   : >> { %p688_p13 = scmp.ne.s32.totalorder %s686_s21, %s687_s23  ;;  %p691_p1 = scmp.lt.s32.totalorder %s960_s11, %s687_s23 }
  0x84   : >> { %p692_p2 = por %p691_p1, %p690_p0 }
  0x86   : >> { %p693_p3 = pnand %p692_p2, %p688_p13 }
  0x88   : >> { %696 = shalt.err (!%p693_p3)  }
  0x89   : >> { %214 = dma.hbm_to_vmem [thread:$0]  %s210_s0, 16, %s982_s22, [#allocation4 + $0x3] }
  0x8a   : >> { %s178_s8 = sadd.s32 1, %s797_s8  }
  0x8b   : >> { %p175_p4 = scmp.ge.s32.totalorder %s178_s8, 8  }
  0x8c   : > { %s799_s1 = smov (%p175_p4), 0  }
  0x8d   : > { %177 = sbr.rel (!%p175_p4) target bundleno = 90 (0x5a), region = 135 }
  0x92 LB: >> { %763 = dma.done.wait [#allocation4], 16  ;;  %s801_s1 = sphi %s799_s1, %s220_s1  }
  0x93   : >> { %764 = vsyncadd [#allocation4], 4294967280 }
  0x94   : >> { %765 = dma.done.wait [#allocation4 + $0x2], 16 }
  0x95   : >> { %766 = vsyncadd [#allocation4 + $0x2], 4294967280  ;;  %s220_s1 = sadd.s32 1, %s801_s1  }
  0x96   : >> { %p217_p7 = scmp.ge.s32.totalorder %s220_s1, 8  }
  0x97   : > { %v227_v3 = vld [vmem:[#allocation2] sm:$0xff] (%p217_p7)  ;;  %v228_v4 = vld [vmem:[#allocation3] sm:$0xff] (%p217_p7)  ;;  %v230_v5 = vperm.slane (%p217_p7), %v903_v0, 0  ;;  %v255_v24 = vperm.slane (%p217_p7), %v905_v1, 0  ;;  %v257_v26 = vperm.slane (%p217_p7), %v907_v2, 0  ;;  %s803_s0 = smov (%p217_p7), 0  }
  0x98   : > { %219 = sbr.rel (!%p217_p7) target bundleno = 146 (0x92), region = 146  ;;  %v229_v6 = vadd.f32 (%p217_p7), %v228_v4, %v227_v3 }
  0x9a   : > { %v231_v7 = vadd.f32 (%p217_p7), %v230_v5, %v229_v6 }
  0x9c   : > { %232 = vadd.xlane.f32.xlu0 (%p217_p7), %v231_v7  ;;  %v234_v8 = vmul.f32 (%p217_p7), %v231_v7, %v231_v7 }
  0xa4   : > { %235 = vadd.xlane.f32.xlu0 %v234_v8 }
 0x10f   : > { %v233_v9 = vpop.xlane.xlu0 %232 }
 0x110   : > { %v237_v10 = vmul.f32 0.0078125, %v233_v9 }
 0x112   : > { %v239_v12 = vmul.f32 %v237_v10, %v237_v10  ;;  %v242_v23 = vsub.f32 %v231_v7, %v237_v10 }
 0x117   : > { %v236_v11 = vpop.xlane.xlu0 %235 }
 0x118   : > { %v238_v13 = vmul.f32 0.0078125, %v236_v11 }
 0x11a   : > { %v240_v14 = vsub.f32 %v238_v13, %v239_v12 }
 0x11c   : > { %v241_v15 = vmax.f32 %v240_v14, 0.0 }
 0x11e   : > { %v243_v16 = vadd.f32 1e-12, %v241_v15 }
 0x120   : > { %543 = vrsqrt.f32 %v243_v16  ;;  %vm250_vm1 = vweird.f32 %v243_v16 }
 0x126   : > { %v544_v17 = vpop.eup %543 }
 0x127   : > { %v245_v18 = vmul.f32 %v544_v17, %v243_v16  ;;  %vm251_vm0 = vweird.f32 %v544_v17 }
 0x128   : > { %vm252_vm2 = vmor %vm250_vm1, %vm251_vm0 }
 0x129   : > { %v246_v19 = vmul.f32 %v544_v17, %v245_v18 }
 0x12b   : > { %v247_v20 = vmul.f32 0.5, %v246_v19 }
 0x12d   : > { %v248_v21 = vsub.f32 1.5, %v247_v20 }
 0x12f   : > { %v249_v22 = vmul.f32 %v544_v17, %v248_v21 }
 0x131   : > { %v253_v25 = vsel %vm252_vm2, %v544_v17, %v249_v22 }
 0x132   : > { %v254_v27 = vmul.f32 %v253_v25, %v242_v23 }
 0x134   : > { %v256_v28 = vmul.f32 %v255_v24, %v254_v27 }
 0x136   : > { %v258_v29 = vadd.f32 %v257_v26, %v256_v28 }
 0x138   : > { %259 = vst [vmem:[%s909_s19] sm:$0xff] %v258_v29 }
 0x139 LB: >> { %767 = dma.done.wait [#allocation4 + $0x1], 16  ;;  %s805_s0 = sphi %s803_s0, %s265_s0  }
 0x13a   : >> { %768 = vsyncadd [#allocation4 + $0x1], 4294967280 }
 0x13b   : >> { %769 = dma.done.wait [#allocation4 + $0x3], 16 }
 0x13c   : >> { %770 = vsyncadd [#allocation4 + $0x3], 4294967280  ;;  %s265_s0 = sadd.s32 1, %s805_s0  }
 0x13d   : >> { %p262_p8 = scmp.ge.s32.totalorder %s265_s0, 8  }
 0x13e   : > { %v274_v30 = vld [vmem:[#allocation2 + $0x8] sm:$0xff] (%p262_p8)  ;;  %v276_v31 = vld [vmem:[#allocation3 + $0x8] sm:$0xff] (%p262_p8)  ;;  %s317_s8 = scalar_lea.hbm (%p262_p8), %s1054_s5, %s899_s17  ;;  %s318_s22 = sshll.u32 (%p262_p8), %s909_s19, 4  ;;  %s319_s22 = int_to_ptr.vmem [resolvable:$true] %s318_s22 }
 0x13f   : > { %264 = sbr.rel (!%p262_p8) target bundleno = 313 (0x139), region = 157  ;;  %v277_v32 = vadd.f32 (%p262_p8), %v276_v31, %v274_v30  ;;  %s320_s6 = sshll.u32 (%p262_p8), %s317_s8, 4  ;;  %s321_s6 = int_to_ptr.hbm [resolvable:$true] %s320_s6 }
 0x140   : > { %s1069_s18 = sand.u32 (%p262_p8), 1, %s781_s27   ;;  %s711_s4 = sshra.s32 (%p262_p8), %s321_s6, 4  ;;  %s712_s4 = int_to_ptr.hbm [resolvable:$true] %s711_s4 }
 0x141   : > { %v278_v33 = vadd.f32 (%p262_p8), %v277_v32, %v230_v5  ;;  %s306_s7 = scalar_lea.sflag (%p262_p8), [#allocation10], %s1069_s18  ;;  %s713_s24 = scalar_lea.hbm (%p262_p8), %s712_s4, 16 }
 0x142   : > { %p714_p9 = scmp.ne.s32.totalorder (%p262_p8), %s712_s4, %s713_s24  ;;  %s717_s20 = scalar_lea.hbm (%p262_p8), %s1054_s5, 32 }
 0x143   : > { %279 = vadd.xlane.f32.xlu0 (%p262_p8), %v278_v33  ;;  %v281_v34 = vmul.f32 (%p262_p8), %v278_v33, %v278_v33  ;;  %p718_p12 = scmp.lt.s32.totalorder (%p262_p8), %s712_s4, %s1054_s5  ;;  %p719_p13 = scmp.lt.s32.totalorder (%p262_p8), %s717_s20, %s713_s24 }
 0x144   : > { %p715_p10 = pnand %p714_p9, %p885_p5 }
 0x145   : > { %p720_p0 = por %p719_p13, %p718_p12 }
 0x146   : > { %p716_p11 = pneg %p715_p10 }
 0x148   : > { %p721_p1 = pnand %p720_p0, %p716_p11 }
 0x14b   : > { %282 = vadd.xlane.f32.xlu0 %v281_v34 }
 0x1b6   : > { %v280_v35 = vpop.xlane.xlu0 %279 }
 0x1b7   : > { %v284_v36 = vmul.f32 0.0078125, %v280_v35 }
 0x1b9   : > { %v286_v38 = vmul.f32 %v284_v36, %v284_v36  ;;  %v289_v49 = vsub.f32 %v278_v33, %v284_v36 }
 0x1be   : > { %v283_v37 = vpop.xlane.xlu0 %282 }
 0x1bf   : > { %v285_v39 = vmul.f32 0.0078125, %v283_v37 }
 0x1c1   : > { %v287_v40 = vsub.f32 %v285_v39, %v286_v38 }
 0x1c3   : > { %v288_v41 = vmax.f32 %v287_v40, 0.0 }
 0x1c5   : > { %v290_v42 = vadd.f32 1e-12, %v288_v41 }
 0x1c7   : > { %545 = vrsqrt.f32 %v290_v42  ;;  %vm297_vm4 = vweird.f32 %v290_v42 }
 0x1cd   : > { %v546_v43 = vpop.eup %545 }
 0x1ce   : > { %v292_v44 = vmul.f32 %v546_v43, %v290_v42  ;;  %vm298_vm3 = vweird.f32 %v546_v43 }
 0x1cf   : > { %vm299_vm5 = vmor %vm297_vm4, %vm298_vm3 }
 0x1d0   : > { %v293_v45 = vmul.f32 %v546_v43, %v292_v44 }
 0x1d2   : > { %v294_v46 = vmul.f32 0.5, %v293_v45 }
 0x1d4   : > { %v295_v47 = vsub.f32 1.5, %v294_v46 }
 0x1d6   : > { %v296_v48 = vmul.f32 %v546_v43, %v295_v47 }
 0x1d8   : > { %v300_v50 = vsel %vm299_vm5, %v546_v43, %v296_v48 }
 0x1d9   : > { %v301_v51 = vmul.f32 %v300_v50, %v289_v49 }
 0x1db   : > { %v302_v52 = vmul.f32 %v301_v51, %v255_v24 }
 0x1dd   : > { %v303_v53 = vadd.f32 %v302_v52, %v257_v26 }
 0x1df   : > { %304 = vst [vmem:[%s909_s19 + $0x8] sm:$0xff] %v303_v53 }
 0x1e0   : > { %724 = shalt.err (!%p721_p1)
}
 0x1e1   : > { %s812_s19 = smov 128   ;;  %s813_s29 = smov 8  }
 0x1e2   : > { %461 = dma.vmem_to_hbm [thread:$0]  (%p885_p5), %s319_s22, 256, %s321_s6, %s306_s7, %s812_s19, %s812_s19, %s813_s29  }
 0x1e3 PF: > { %p473_p2 = scmp.ge.s32.totalorder %s789_s28, 2  ;;  %s335_s16 = sand.u32 1, %s777_s26  }
 0x1e4   : > { %s336_s15 = scalar_lea.sflag [#allocation10], %s335_s16 }
 0x1e5   : > { %p468_p3 = pnand %p473_p2, %p889_p6 }
 0x1e7   : > { %p469_p4 = pneg %p468_p3 }
 0x1e9   : > { %772 = dma.done.wait (%p469_p4), %s336_s15, 256  }
 0x1ea   : > { %774 = vsyncadd (%p469_p4), %s336_s15, 4294967040  ;;  %s1070_s21 = sld [smem:[#allocation29_spill]]  ;;  %p29_p7 = scmp.ge.s32.totalorder %s873_s30, 4  }
 0x1eb   : > { %s1071_s0 = sld [smem:[#allocation30_spill]]  ;;  %s1072_s26 = smov %s781_s27 }
 0x1ec   : > { %s1074_s28 = smov %s873_s30  ;;  %31 = sbr.rel (!%p29_p7) target bundleno = 12 (0xc), region = 168 }
 0x1f0   : > { %s1073_s27 = smov %s1070_s21 }
 0x1f1   :  { %342 = vsyncpa [#allocation9], 1 }
 0x1f2   :  { %344 = vsyncpa [#allocation9 + $0x1], 1 }
 0x1f3   :  { %345 = vsyncpa [#allocation10], 1 }
 0x1f4   :  { %347 = vsyncpa [#allocation10 + $0x1], 1 }
 0x1f5   :  { %348 = vsyncmov [#allocation4] }
 0x1f8   :  { %s349_s28 = vpop.sfrf %348 }
 0x1f9   :  { %p452_p5 = scmp.ne.s32.totalorder %s349_s28, 0 }
 0x1fb   :  { %353 = shalt.err (%p452_p5)  }
 0x1fc   :  { %355 = vsyncmov [#allocation4 + $0x1] }
 0x1ff   :  { %s356_s9 = vpop.sfrf %355 }
 0x200   :  { %p453_p6 = scmp.ne.s32.totalorder %s356_s9, 0 }
 0x202   :  { %360 = shalt.err (%p453_p6)  }
 0x203   :  { %362 = vsyncmov [#allocation4 + $0x2] }
 0x206   :  { %s363_s10 = vpop.sfrf %362 }
 0x207   :  { %p454_p8 = scmp.ne.s32.totalorder %s363_s10, 0 }
 0x209   :  { %367 = shalt.err (%p454_p8)  }
 0x20a   :  { %369 = vsyncmov [#allocation4 + $0x3] }
 0x20d   :  { %s370_s23 = vpop.sfrf %369 }
 0x20e   :  { %p455_p9 = scmp.ne.s32.totalorder %s370_s23, 0 }
 0x210   :  { %374 = shalt.err (%p455_p9)  }

</bundles_post_ra>
